<compile_context>
chip_gen: v5e
topology: v5e:2x2
jax: 0.10.0
libtpu: 0.0.40
codegen_flags: <defaults>
</compile_context>

<pallas_src>
import functools

import jax
import jax.numpy as jnp
from jax.experimental import pallas as pl
from jax.experimental.pallas import tpu as pltpu

# Sobel filter taps -- same values as the module's __init__ (deterministic).
KX = ((-1.0, -2.0, -1.0),
      ( 0.0,  0.0,  0.0),
      ( 1.0,  2.0,  1.0))
KY = ((-1.0,  0.0,  1.0),
      (-2.0,  0.0,  2.0),
      (-1.0,  0.0,  1.0))


def _round_up(n, m):
    return ((n + m - 1) // m) * m


def _roll(x, shift, axis):
    """Circular roll (XLU); normalize negative static shifts."""
    return pltpu.roll(x, shift % x.shape[axis], axis)


def _sobel_mag(img):
    """sqrt(gx^2 + gy^2 + 1e-5) of the zero-padded 3x3 Sobel, separable form.

    `img` is a padded (Hp, Wp) tile whose trailing row(s)/column(s) are zero,
    so the circular rolls reproduce zero padding exactly inside the true
    image region (values outside it are masked out downstream).
    """
    img2 = img + img                                     # reused by both smoothers
    s_h = _roll(img, 1, 1) + img2 + _roll(img, -1, 1)    # [1,2,1] along W
    s_v = _roll(img, 1, 0) + img2 + _roll(img, -1, 0)    # [1,2,1] along H
    gx = _roll(s_h, -1, 0) - _roll(s_h, 1, 0)            # central diff along H (KX)
    gy = _roll(s_v, -1, 1) - _roll(s_v, 1, 1)            # central diff along W (KY)
    return jnp.sqrt(gx * gx + gy * gy + 1e-5)


def _event_sobel_kernel(ev_ref, sev_ref, acc_ref, *, true_h, true_w):
    """Grid over event channels: accumulate channel sum, Sobel on last step."""
    c = pl.program_id(0)

    @pl.when(c == 0)
    def _():
        acc_ref[...] = ev_ref[0, 0]

    @pl.when(c > 0)
    def _():
        acc_ref[...] += ev_ref[0, 0]

    @pl.when(c == pl.num_programs(0) - 1)
    def _():
        sev = _sobel_mag(acc_ref[...])
        hp, wp = sev.shape
        row = jax.lax.broadcasted_iota(jnp.int32, (hp, wp), 0)
        col = jax.lax.broadcasted_iota(jnp.int32, (hp, wp), 1)
        valid = jnp.logical_and(row < true_h, col < true_w)
        # Fold the validity mask into the cached map once; the padded
        # rows/cols of every per-image product are then zero for free.
        sev_ref[...] = jnp.where(valid, sev, 0.0)


def _image_dot_kernel(x_ref, sev_ref, out_ref):
    """x_ref: (Bt,1,Hp,Wp) padded images; sev_ref: (Hp,Wp) masked sobel_ev."""
    sev = sev_ref[...]
    acc = None
    for t in range(x_ref.shape[0]):                 # small static unroll, Bt <= 8
        sx = _sobel_mag(x_ref[t, 0])
        prod = sev * sx
        s = jnp.sum(prod, axis=1, keepdims=True)    # (Hp, 1) lane reduce
        s = jnp.sum(s, axis=0, keepdims=True)       # (1, 1)  sublane reduce
        acc = s if acc is None else acc + s
    out_ref[...] = jnp.reshape(acc, (1, 1, 1))


def _pick_batch_tile(batch, img_bytes, budget_bytes=4 * 1024 * 1024, max_tile=8):
    """Largest divisor of `batch` that keeps the x block small and unroll short."""
    bt = int(max(1, min(batch, max_tile, budget_bytes // max(img_bytes, 1))))
    while batch % bt:
        bt -= 1
    return bt


def sobel_loss(x, event):
    """x: (B, 1, H, W), event: (1, Ce, H, W) -> scalar float32 loss."""
    B, C, H, W = x.shape
    Be, Ce, He, We = event.shape
    assert C == 1, "F.conv2d with a (1,1,3,3) filter requires single-channel x"
    assert Be == 1 and (He, We) == (H, W)

    # Pad so the last two dims are sublane/lane dense AND carry at least one
    # trailing all-zero row and column: circular rolls then reproduce the
    # zero-padded 3x3 conv exactly inside the true HxW region.
    Hp = _round_up(H + 1, 8)
    Wp = _round_up(W + 1, 128)
    xp = jnp.pad(x.astype(jnp.float32),
                 ((0, 0), (0, 0), (0, Hp - H), (0, Wp - W)))
    evp = jnp.pad(event.astype(jnp.float32),
                  ((0, 0), (0, 0), (0, Hp - H), (0, Wp - W)))

    map_bytes = 4 * Hp * Wp
    vmem_cap = lambda est: int(min(128 * 1024 * 1024,
                                   max(32 * 1024 * 1024, est)))

    # --- Pass 1: batch-invariant sobel_ev, computed exactly once. -----------
    sobel_ev = pl.pallas_call(
        functools.partial(_event_sobel_kernel, true_h=H, true_w=W),
        out_shape=jax.ShapeDtypeStruct((Hp, Wp), jnp.float32),
        grid=(Ce,),
        in_specs=[pl.BlockSpec((1, 1, Hp, Wp), lambda c: (0, c, 0, 0))],
        out_specs=pl.BlockSpec((Hp, Wp), lambda c: (0, 0)),
        scratch_shapes=[pltpu.VMEM((Hp, Wp), jnp.float32)],
        compiler_params=pltpu.CompilerParams(
            dimension_semantics=("arbitrary",),
            vmem_limit_bytes=vmem_cap(14 * map_bytes)),
    )(evp)

    # --- Pass 2: per-batch-tile Sobel + dot with the cached sobel_ev. -------
    Bt = _pick_batch_tile(B, map_bytes)
    nB = B // Bt
    cost = pl.CostEstimate(
        flops=14 * B * Hp * Wp,
        transcendentals=B * Hp * Wp,
        bytes_accessed=4 * (B * Hp * Wp + Hp * Wp + B))
    vmem_limit = vmem_cap((2 * Bt + 12) * map_bytes)

    def image_pass(single_buffer_sev):
        sev_kw = {"pipeline_mode": pl.Buffered(1)} if single_buffer_sev else {}
        return pl.pallas_call(
            _image_dot_kernel,
            out_shape=jax.ShapeDtypeStruct((nB, 1, 1), jnp.float32),
            grid=(nB,),
            in_specs=[
                pl.BlockSpec((Bt, 1, Hp, Wp), lambda g: (g, 0, 0, 0)),
                # Constant block index: DMA'd once; single-buffered because it
                # never changes (saves one Hp*Wp*4B VMEM buffer).
                pl.BlockSpec((Hp, Wp), lambda g: (0, 0), **sev_kw),
            ],
            out_specs=pl.BlockSpec((1, 1, 1), lambda g: (g, 0, 0)),
            compiler_params=pltpu.CompilerParams(
                dimension_semantics=("parallel",),
                vmem_limit_bytes=vmem_limit),
            cost_estimate=cost,
        )(xp, sobel_ev)

    try:
        partials = image_pass(True)
    except Exception:
        # TODO(synk): drop the fallback once pl.Buffered(1) single-buffering of
        # resident blocks is guaranteed on the deployed jax/libtpu version.
        partials = image_pass(False)

    # Single divide + reduction over per-tile partials (done once, not per step).
    return jnp.sum(partials) / (B * C * H * W)


def sobel_loss_ref(x, event):
    """Pure-JAX reference (mirrors the PyTorch forward) for validation."""
    ev = event.sum(axis=1, keepdims=True)
    kx = jnp.array(KX, jnp.float32).reshape(1, 1, 3, 3)
    ky = jnp.array(KY, jnp.float32).reshape(1, 1, 3, 3)

    def conv(a, k):
        return jax.lax.conv_general_dilated(
            a, k, window_strides=(1, 1), padding=((1, 1), (1, 1)),
            dimension_numbers=("NCHW", "OIHW", "NCHW"))

    B, C, H, W = x.shape
    sev = jnp.sqrt(conv(ev, kx) ** 2 + conv(ev, ky) ** 2 + 1e-5)
    sx = jnp.sqrt(conv(x, kx) ** 2 + conv(x, ky) ** 2 + 1e-5)
    return (sev * sx).sum() / (B * C * H * W)


if __name__ == "__main__":
    key = jax.random.PRNGKey(0)
    kx_key, ke_key = jax.random.split(key)
    x = jax.random.normal(kx_key, (2, 1, 16, 16), dtype=jnp.float32)
    event = jax.random.normal(ke_key, (1, 3, 16, 16), dtype=jnp.float32)

    out = jax.block_until_ready(sobel_loss(x, event))
    ref = jax.block_until_ready(sobel_loss_ref(x, event))
    assert jnp.allclose(out, ref, rtol=1e-4, atol=1e-5), (out, ref)
    print("KERNEL_OK")
</pallas_src>

<mosaic_0001>
module attributes {stable_mosaic.version = 11 : i64} {
  func.func @_event_sobel_kernel(%arg0: i32, %arg1: memref<1x1x24x128xf32, #tpu.memory_space<vmem>>, %arg2: memref<24x128xf32, #tpu.memory_space<vmem>>, %arg3: memref<24x128xf32, #tpu.memory_space<vmem>>) attributes {dimension_semantics = [#tpu.dimension_semantics<arbitrary>], iteration_bounds = array<i64: 3>, scalar_prefetch = 0 : i64, scratch_operands = 1 : i64, tpu.core_type = #tpu.core_type<tc>, window_params = [{transform_indices = @transform_0, window_bounds = array<i64: 1, 1, 24, 128>}, {pipeline_mode = #tpu.pipeline_mode<synchronous>, transform_indices = @transform_1, window_bounds = array<i64: 24, 128>}]} {
    %c0_i32 = arith.constant 0 : i32
    %0 = arith.cmpi eq, %arg0, %c0_i32 : i32
    %1 = arith.extui %0 : i1 to i32
    %c0_i32_0 = arith.constant 0 : i32
    %2 = arith.cmpi ne, %1, %c0_i32_0 : i32
    scf.if %2 {
      %c0 = arith.constant 0 : index
      %c0_4 = arith.constant 0 : index
      %c0_5 = arith.constant 0 : index
      %c0_6 = arith.constant 0 : index
      %9 = vector.load %arg1[%c0, %c0_4, %c0_5, %c0_6] : memref<1x1x24x128xf32, #tpu.memory_space<vmem>>, vector<1x1x24x128xf32>
      %10 = vector.shape_cast %9 : vector<1x1x24x128xf32> to vector<24x128xf32>
      %c0_7 = arith.constant 0 : index
      %c0_8 = arith.constant 0 : index
      %11 = vector.load %arg3[%c0_7, %c0_8] : memref<24x128xf32, #tpu.memory_space<vmem>>, vector<24x128xf32>
      tpu.vector_store %arg3[%c0_7, %c0_8], %10 {strides = array<i32>} : memref<24x128xf32, #tpu.memory_space<vmem>>, vector<24x128xf32>,
    } else {
    }
    %c0_i32_1 = arith.constant 0 : i32
    %3 = arith.cmpi sgt, %arg0, %c0_i32_1 : i32
    %4 = arith.extui %3 : i1 to i32
    %c0_i32_2 = arith.constant 0 : i32
    %5 = arith.cmpi ne, %4, %c0_i32_2 : i32
    scf.if %5 {
      %c0 = arith.constant 0 : index
      %c0_4 = arith.constant 0 : index
      %9 = vector.load %arg3[%c0, %c0_4] : memref<24x128xf32, #tpu.memory_space<vmem>>, vector<24x128xf32>
      %c0_5 = arith.constant 0 : index
      %c0_6 = arith.constant 0 : index
      %c0_7 = arith.constant 0 : index
      %c0_8 = arith.constant 0 : index
      %10 = vector.load %arg1[%c0_5, %c0_6, %c0_7, %c0_8] : memref<1x1x24x128xf32, #tpu.memory_space<vmem>>, vector<1x1x24x128xf32>
      %11 = vector.shape_cast %10 : vector<1x1x24x128xf32> to vector<24x128xf32>
      %12 = arith.addf %9, %11 : vector<24x128xf32>
      %c0_9 = arith.constant 0 : index
      %c0_10 = arith.constant 0 : index
      %13 = vector.load %arg3[%c0_9, %c0_10] : memref<24x128xf32, #tpu.memory_space<vmem>>, vector<24x128xf32>
      tpu.vector_store %arg3[%c0_9, %c0_10], %12 {strides = array<i32>} : memref<24x128xf32, #tpu.memory_space<vmem>>, vector<24x128xf32>,
    } else {
    }
    %c2_i32 = arith.constant 2 : i32
    %6 = arith.cmpi eq, %arg0, %c2_i32 : i32
    %7 = arith.extui %6 : i1 to i32
    %c0_i32_3 = arith.constant 0 : i32
    %8 = arith.cmpi ne, %7, %c0_i32_3 : i32
    scf.if %8 {
      %c0 = arith.constant 0 : index
      %c0_4 = arith.constant 0 : index
      %9 = vector.load %arg3[%c0, %c0_4] : memref<24x128xf32, #tpu.memory_space<vmem>>, vector<24x128xf32>
      %10 = arith.addf %9, %9 : vector<24x128xf32>
      %c1_i32 = arith.constant 1 : i32
      %11 = tpu.dynamic_rotate %9 by %c1_i32 dim 1 : vector<24x128xf32>, i32 -> vector<24x128xf32>
      %12 = arith.addf %11, %10 : vector<24x128xf32>
      %c127_i32 = arith.constant 127 : i32
      %13 = tpu.dynamic_rotate %9 by %c127_i32 dim 1 : vector<24x128xf32>, i32 -> vector<24x128xf32>
      %14 = arith.addf %12, %13 : vector<24x128xf32>
      %c1_i32_5 = arith.constant 1 : i32
      %15 = tpu.dynamic_rotate %9 by %c1_i32_5 dim 0 : vector<24x128xf32>, i32 -> vector<24x128xf32>
      %16 = arith.addf %15, %10 : vector<24x128xf32>
      %c23_i32 = arith.constant 23 : i32
      %17 = tpu.dynamic_rotate %9 by %c23_i32 dim 0 : vector<24x128xf32>, i32 -> vector<24x128xf32>
      %18 = arith.addf %16, %17 : vector<24x128xf32>
      %c23_i32_6 = arith.constant 23 : i32
      %19 = tpu.dynamic_rotate %14 by %c23_i32_6 dim 0 : vector<24x128xf32>, i32 -> vector<24x128xf32>
      %c1_i32_7 = arith.constant 1 : i32
      %20 = tpu.dynamic_rotate %14 by %c1_i32_7 dim 0 : vector<24x128xf32>, i32 -> vector<24x128xf32>
      %21 = arith.subf %19, %20 : vector<24x128xf32>
      %c127_i32_8 = arith.constant 127 : i32
      %22 = tpu.dynamic_rotate %18 by %c127_i32_8 dim 1 : vector<24x128xf32>, i32 -> vector<24x128xf32>
      %c1_i32_9 = arith.constant 1 : i32
      %23 = tpu.dynamic_rotate %18 by %c1_i32_9 dim 1 : vector<24x128xf32>, i32 -> vector<24x128xf32>
      %24 = arith.subf %22, %23 : vector<24x128xf32>
      %25 = arith.mulf %21, %21 : vector<24x128xf32>
      %26 = arith.mulf %24, %24 : vector<24x128xf32>
      %27 = arith.addf %25, %26 : vector<24x128xf32>
      %cst = arith.constant 9.99999974E-6 : f32
      %28 = vector.broadcast %cst : f32 to vector<24x128xf32>
      %29 = arith.addf %27, %28 : vector<24x128xf32>
      %30 = math.sqrt %29 : vector<24x128xf32>
      %31 = tpu.iota {dimensions = array<i32: 0>} : vector<24x128xi32>
      %32 = tpu.iota {dimensions = array<i32: 1>} : vector<24x128xi32>
      %c16_i32 = arith.constant 16 : i32
      %33 = vector.broadcast %c16_i32 : i32 to vector<24x128xi32>
      %34 = arith.cmpi slt, %31, %33 : vector<24x128xi32>
      %c16_i32_10 = arith.constant 16 : i32
      %35 = vector.broadcast %c16_i32_10 : i32 to vector<24x128xi32>
      %36 = arith.cmpi slt, %32, %35 : vector<24x128xi32>
      %37 = arith.andi %34, %36 : vector<24x128xi1>
      %cst_11 = arith.constant 0.000000e+00 : f32
      %38 = vector.broadcast %cst_11 : f32 to vector<24x128xf32>
      %39 = arith.select %37, %30, %38 : vector<24x128xi1>, vector<24x128xf32>
      %c0_12 = arith.constant 0 : index
      %c0_13 = arith.constant 0 : index
      %40 = vector.load %arg2[%c0_12, %c0_13] : memref<24x128xf32, #tpu.memory_space<vmem>>, vector<24x128xf32>
      tpu.vector_store %arg2[%c0_12, %c0_13], %39 {strides = array<i32>} : memref<24x128xf32, #tpu.memory_space<vmem>>, vector<24x128xf32>,
    } else {
    }
    return
  }
  func.func @transform_0(%arg0: i32) -> (i32, i32, i32, i32) {
    %c0_i32 = arith.constant 0 : i32
    %c0_i32_0 = arith.constant 0 : i32
    %c0_i32_1 = arith.constant 0 : i32
    %c0_i32_2 = arith.constant 0 : i32
    return %c0_i32, %arg0, %c0_i32_0, %c0_i32_1 : i32, i32, i32, i32
  }
  func.func @transform_1(%arg0: i32) -> (i32, i32) {
    %c0_i32 = arith.constant 0 : i32
    %c0_i32_0 = arith.constant 0 : i32
    %c0_i32_1 = arith.constant 0 : i32
    return %c0_i32, %c0_i32_0 : i32, i32
  }
}

</mosaic_0001>

<bundles_post_ra>
// kernel: tpu_custom_call.1
= control target key start
LH: loop header
LB: loop body
LE: loop exit
PB: predicated region body
PF: predicated region fallthrough
CT: control target
= control target key end

     0   :  { %6 = vsyncpa [#allocation4], 0  ;;  %s650_s0 = inlined_call_operand.hbm [shape: f32[1,3,24,128], index: 0, kind: input, shape index: {}]   ;;  %s651_s1 = inlined_call_operand.hbm [shape: f32[24,128], index: 1, kind: output, shape index: {}]  }
   0x1   :  { %8 = vsyncpa [#allocation4 + $0x1], 0 }
   0x2   :  { %9 = vsyncpa [#allocation5], 0  ;;  %s545_s6 = smov 0   ;;  %s547_s7 = smov 0  }
   0x3   :  { %s549_s8 = smov 0   ;;  %s551_s9 = smov 0  }
   0x4 LB: > { %s564_s10 = sadd.s32 4294967295, %s525_s9   ;;  %s567_s11 = sadd.s32 1, %s525_s9   ;;  %s525_s9 = sphi %s551_s9, %s657_s9   ;;  %s521_s8 = sphi %s549_s8, %s656_s8   ;;  %s517_s7 = sphi %s547_s7, %s655_s7   ;;  %s513_s6 = sphi %s545_s6, %s654_s6  }
   0x5   : > { %s19_s12 = ssub.s32 %s525_s9, %s567_s11  ;;  %s22_s13 = sadd.s32 1, %s521_s8 }
   0x6   : > { %p20_p0 = scmp.eq.s32.totalorder %s19_s12, 0  ;;  %p29_p1 = scmp.ne.s32.totalorder %s521_s8, %s517_s7 }
   0x7   : > { %p30_p2 = scmp.eq.s32.totalorder %s525_s9, 0  ;;  %p35_p3 = scmp.ne.s32.totalorder %s517_s7, %s513_s6 }
   0x8   : > { %s577_s14 = scalar_select %p20_p0, %s521_s8, %s22_s13  }
   0x9   : > { %p31_p4 = por %p30_p2, %p29_p1  ;;  %p36_p5 = scmp.eq.s32.totalorder %s564_s10, 0 }
   0xa   : > { %p382_p6 = scmp.lt.s32.totalorder %s525_s9, 3  ;;  %s80_s16 = sand.u32 1, %s521_s8  }
   0xb   : > { %p581_p7 = por %p36_p5, %p35_p3  ;;  %s369_s17 = smul.u32 24, %s80_s16 }
   0xc   : > { %s370_s18 = smul.u32 24, %s525_s9  ;;  %p587_p8 = pnand %p382_p6, %p31_p4 }
   0xd   : > { %s84_s23 = scalar_lea.vmem [#allocation3], %s369_s17  ;;  %p361_p9 = scmp.ge.s32.totalorder %s525_s9, 1 }
   0xe   : > { %s89_s22 = scalar_lea.hbm %s650_s0, %s370_s18  ;;  %s92_s24 = sshll.u32 %s84_s23, 4  ;;  %s93_s24 = int_to_ptr.vmem [resolvable:$true] %s92_s24 }
   0xf   : > { %s90_s25 = sshll.u32 %s89_s22, 4  ;;  %s81_s26 = scalar_lea.sflag [#allocation4], %s80_s16  ;;  %s91_s25 = int_to_ptr.hbm [resolvable:$true] %s90_s25 }
  0x10   : > { %s429_s27 = sshra.s32 %s91_s25, 4  ;;  %p433_p11 = pneg %p587_p8  ;;  %s430_s27 = int_to_ptr.hbm [resolvable:$true] %s429_s27 }
  0x11   : > { %s431_s28 = scalar_lea.hbm %s430_s27, 24  ;;  %s436_s2 = scalar_lea.hbm %s650_s0, 72 }
  0x12   : > { %p432_p10 = scmp.ne.s32.totalorder %s430_s27, %s431_s28  ;;  %p437_p0 = scmp.lt.s32.totalorder %s430_s27, %s650_s0 }
  0x13   : > { %p438_p1 = scmp.lt.s32.totalorder %s436_s2, %s431_s28 }
  0x14   : > { %p434_p12 = pnand %p433_p11, %p432_p10 }
  0x15   : > { %p439_p2 = por %p438_p1, %p437_p0 }
  0x16   : > { %p435_p13 = pneg %p434_p12 }
  0x18   : > { %p440_p3 = pnand %p439_p2, %p435_p13 }
  0x1a   : > { %443 = shalt.err (!%p440_p3)
}
  0x1b   : > { %s527_s5 = smov 128   ;;  %s528_s6 = smov 8  }
  0x1c   : > { %381 = dma.hbm_to_vmem [thread:$0]  (!%p587_p8), %s91_s25, 384, %s93_s24, %s81_s26, %s527_s5, %s527_s5, %s528_s6  }
  0x1d   : > { %p100_p4 = scmp.lt.s32.totalorder %s525_s9, 4 }
  0x1f   : > { %p101_p5 = pnand %p361_p9, %p100_p4 }
  0x20   : > { %s106_s12 = sand.u32 (!%p101_p5), 1, %s517_s7  }
  0x21   : > { %104 = sbr.rel (%p101_p5) target bundleno = 248 (0xf8), region = 24  ;;  %s107_s16 = scalar_lea.sflag (!%p101_p5), [#allocation4], %s106_s12 }
  0x22   : > { %s371_s13 = smul.u32 (!%p101_p5), 24, %s106_s12 }
  0x24   : > { %s110_s17 = scalar_lea.vmem (!%p101_p5), [#allocation3], %s371_s13 }
  0x26   : > { %504 = dma.done.wait (%p581_p7), %s107_s16, 384  }
  0x27   : > { %506 = vsyncadd (%p581_p7), %s107_s16, 4294966912  ;;  %p362_p6 = scmp.ne.s32.totalorder %s564_s10, 0 }
  0x29   : > { %128 = sbr.rel (%p362_p6) target bundleno = 50 (0x32), region = 32 }
  0x2e   : > { %v129_v0 = vld [vmem:[%s110_s17] sm:$0xff]  ;;  %v130_v1 = vld [vmem:[%s110_s17 + $0x8] sm:$0xff]  ;;  %v131_v2 = vld [vmem:[%s110_s17 + $0x10] sm:$0xff] }
  0x2f   : > { %132 = vst [vmem:[#allocation2 + $0x10] sm:$0xff] %v129_v0 }
  0x30   : > { %133 = vst [vmem:[#allocation2] sm:$0xff] %v130_v1 }
  0x31   : > { %134 = vst [vmem:[#allocation2 + $0x8] sm:$0xff] %v131_v2 }
  0x32 PF: > { %p363_p8 = scmp.le.s32.totalorder %s564_s10, 0 }
  0x34   : > { %138 = sbr.rel (%p363_p8) target bundleno = 64 (0x40), region = 36 }
  0x39   : > { %v139_v3 = vld [vmem:[#allocation2 + $0x10] sm:$0xff]  ;;  %v140_v5 = vld [vmem:[#allocation2] sm:$0xff]  ;;  %v141_v8 = vld [vmem:[#allocation2 + $0x8] sm:$0xff] }
  0x3a   : > { %v142_v4 = vld [vmem:[%s110_s17] sm:$0xff]  ;;  %v143_v7 = vld [vmem:[%s110_s17 + $0x8] sm:$0xff]  ;;  %v144_v9 = vld [vmem:[%s110_s17 + $0x10] sm:$0xff] }
  0x3b   : > { %v145_v6 = vadd.f32 %v142_v4, %v139_v3  ;;  %v146_v10 = vadd.f32 %v143_v7, %v140_v5  ;;  %v147_v11 = vadd.f32 %v144_v9, %v141_v8 }
  0x3d   : > { %148 = vst [vmem:[#allocation2 + $0x10] sm:$0xff] %v145_v6 }
  0x3e   : > { %149 = vst [vmem:[#allocation2] sm:$0xff] %v146_v10 }
  0x3f   : > { %150 = vst [vmem:[#allocation2 + $0x8] sm:$0xff] %v147_v11 }
  0x40 PF: > { %p364_p7 = scmp.ne.s32.totalorder %s564_s10, 2 }
  0x41   : > { %s529_s9 = smov (!%p364_p7), 1   ;;  %s530_s15 = smov (!%p364_p7), 127  }
  0x42   : > { %154 = sbr.rel (%p364_p7) target bundleno = 242 (0xf2), region = 40 }
  0x47   : > { %v157_v12 = vld [vmem:[#allocation2 + $0x8] sm:$0xff]  ;;  %v155_v13 = vld [vmem:[#allocation2 + $0x10] sm:$0xff]  ;;  %v182_v14 = vlaneseq  ;;  %v156_v15 = vld [vmem:[#allocation2] sm:$0xff]  ;;  %v531_v3 = vmov 0.0  }
  0x48   : > { %165 = vrot.lane.b32.xlu1 %v157_v12, %s529_s9  ;;  %161 = vrot.lane.b32.xlu0 %v155_v13, %s529_s9  ;;  %v179_v16 = vrot.slane %v155_v13, 7  ;;  %v181_v17 = vrot.slane %v157_v12, 7  ;;  %v180_v19 = vrot.slane %v156_v15, 7  ;;  %v158_v20 = vadd.f32 %v155_v13, %v155_v13  ;;  %295 = vst [vmem:[#allocation6 + $0x10] sm:$0xff] %v531_v3 }
  0x49   : > { %v183_v18 = vshrl.u32 %v182_v14, 7  ;;  %172 = vrot.lane.b32.xlu2 %v156_v15, %s530_s15  ;;  %v191_v21 = vrot.slane %v155_v13, 1  ;;  %v159_v22 = vadd.f32 %v156_v15, %v156_v15  ;;  %v192_v24 = vrot.slane %v156_v15, 1 }
  0x4a   : > { %v193_v26 = vrot.slane %v157_v12, 1  ;;  %v160_v34 = vadd.f32 %v157_v12, %v157_v12 }
  0x4b   : > { %vm184_vm0 = vcmp.lt.s32.totalorder %v183_v18, 1  ;;  %vm194_vm1 = vcmp.lt.s32.totalorder %v183_v18, 7 }
  0x4c   : > { %v187_v23 = vsel %vm184_vm0, %v181_v17, %v179_v16  ;;  %v186_v25 = vsel %vm184_vm0, %v179_v16, %v180_v19  ;;  %v196_v29 = vsel %vm194_vm1, %v191_v21, %v192_v24  ;;  %v195_v30 = vsel %vm194_vm1, %v192_v24, %v193_v26 }
  0x4d   : > { %v188_v27 = vadd.f32 %v187_v23, %v158_v20  ;;  %v189_v28 = vadd.f32 %v186_v25, %v159_v22 }
  0x4f   : > { %v198_v31 = vadd.f32 %v196_v29, %v188_v27  ;;  %v199_v32 = vadd.f32 %v195_v30, %v189_v28 }
  0x50   : > { %170 = vrot.lane.b32.xlu1 %v155_v13, %s530_s15  ;;  %163 = vrot.lane.b32.xlu0 %v156_v15, %s529_s9  ;;  %v282_v15 = vand.u32 127, %v182_v14 }
  0x51   : > { %174 = vrot.lane.b32.xlu2 %v157_v12, %s530_s15 }
  0x52   : > { %vm286_vm2 = vcmp.lt.s32.totalorder %v282_v15, 16 }
  0x58   : > { %216 = vrot.lane.b32.xlu0 %v198_v31, %s530_s15  ;;  %218 = vrot.lane.b32.xlu1 %v199_v32, %s530_s15 }
  0x59   : > { %222 = vrot.lane.b32.xlu2 %v198_v31, %s529_s9 }
  0x60   : > { %224 = vrot.lane.b32.xlu0 %v199_v32, %s529_s9 }
  0xa3   : > { %v173_v33 = vpop.permute.xlu2 %172 }
  0xab   : > { %v175_v38 = vpop.permute.xlu2 %174 }
  0xb3   : > { %v223_v50 = vpop.permute.xlu2 %222 }
  0xba   : > { %v166_v35 = vpop.permute.xlu1 %165  ;;  %v162_v36 = vpop.permute.xlu0 %161 }
  0xbb   : > { %v169_v37 = vadd.f32 %v166_v35, %v160_v34  ;;  %v167_v39 = vadd.f32 %v162_v36, %v158_v20 }
  0xbd   : > { %v178_v40 = vadd.f32 %v175_v38, %v169_v37 }
  0xbf   : > { %v209_v45 = vrot.slane %v178_v40, 7  ;;  %v203_v55 = vrot.slane %v178_v40, 1 }
  0xc2   : > { %v171_v41 = vpop.permute.xlu1 %170  ;;  %v164_v42 = vpop.permute.xlu0 %163 }
  0xc3   : > { %v176_v43 = vadd.f32 %v171_v41, %v167_v39  ;;  %v168_v44 = vadd.f32 %v164_v42, %v159_v22 }
  0xc5   : > { %v207_v46 = vrot.slane %v176_v43, 7  ;;  %v177_v47 = vadd.f32 %v173_v33, %v168_v44  ;;  %v201_v48 = vrot.slane %v176_v43, 1 }
  0xc7   : > { %v202_v49 = vrot.slane %v177_v47, 1  ;;  %v212_v52 = vsel %vm184_vm0, %v209_v45, %v207_v46  ;;  %v208_v56 = vrot.slane %v177_v47, 7 }
  0xc9   : > { %v205_v51 = vsel %vm194_vm1, %v201_v48, %v202_v49  ;;  %v204_v61 = vsel %vm194_vm1, %v202_v49, %v203_v55  ;;  %v211_v62 = vsel %vm184_vm0, %v207_v46, %v208_v56 }
  0xca   : > { %v217_v53 = vpop.permute.xlu0 %216  ;;  %v213_v54 = vsub.f32 %v205_v51, %v212_v52  ;;  %v219_v0 = vpop.permute.xlu1 %218  ;;  %v214_v2 = vsub.f32 %v204_v61, %v211_v62 }
  0xcb   : > { %v228_v57 = vsub.f32 %v217_v53, %v223_v50 }
  0xcc   : > { %v231_v58 = vmul.f32 %v213_v54, %v213_v54  ;;  %v232_v5 = vmul.f32 %v214_v2, %v214_v2 }
  0xcd   : > { %v234_v59 = vmul.f32 %v228_v57, %v228_v57 }
  0xcf   : > { %v237_v60 = vadd.f32 %v234_v59, %v231_v58 }
  0xd1   : > { %v240_v63 = vadd.f32 1e-05, %v237_v60 }
  0xd2   : > { %v225_v1 = vpop.permute.xlu0 %224 }
  0xd3   : > { %425 = vrsqrt.f32 %v240_v63  ;;  %v229_v4 = vsub.f32 %v219_v0, %v225_v1  ;;  %vm250_vm3 = vcmp.eq.f32.partialorder %v240_v63, inf  ;;  %v253_v20 = vand.u32 2147483648, %v240_v63 }
  0xd4   : > { %vm252_vm4 = vcmp.eq.f32.partialorder %v240_v63, 0.0 }
  0xd5   : > { %v235_v6 = vmul.f32 %v229_v4, %v229_v4 }
  0xd7   : > { %v238_v7 = vadd.f32 %v235_v6, %v232_v5 }
  0xd9   : > { %v426_v8 = vpop.eup %425  ;;  %v241_v10 = vadd.f32 1e-05, %v238_v7 }
  0xda   : > { %v244_v9 = vmul.f32 %v426_v8, %v240_v63 }
  0xdb   : > { %427 = vrsqrt.f32 %v241_v10  ;;  %vm262_vm5 = vcmp.eq.f32.partialorder %v241_v10, inf  ;;  %v265_v14 = vand.u32 2147483648, %v241_v10  ;;  %vm264_vm6 = vcmp.eq.f32.partialorder %v241_v10, 0.0 }
  0xdc   : > { %v245_v11 = vmul.f32 %v426_v8, %v244_v9 }
  0xde   : > { %v246_v12 = vmul.f32 0.5, %v245_v11 }
  0xe0   : > { %v247_v13 = vsub.f32 1.5, %v246_v12 }
  0xe1   : > { %v428_v16 = vpop.eup %427 }
  0xe2   : > { %v248_v17 = vmul.f32 %v426_v8, %v247_v13  ;;  %v256_v18 = vmul.f32 %v428_v16, %v241_v10 }
  0xe4   : > { %v249_v19 = vmul.f32 %v248_v17, %v240_v63  ;;  %v257_v21 = vmul.f32 %v428_v16, %v256_v18 }
  0xe6   : > { %v251_v22 = vsel %vm250_vm3, %v240_v63, %v249_v19  ;;  %v258_v24 = vmul.f32 0.5, %v257_v21 }
  0xe7   : > { %v254_v23 = vsel %vm252_vm4, %v253_v20, %v251_v22 }
  0xe8   : > { %v290_v25 = vsel %vm286_vm2, %v254_v23, 0.0  ;;  %v259_v26 = vsub.f32 1.5, %v258_v24 }
  0xe9   : > { %293 = vst [vmem:[#allocation6] sm:$0xff] %v290_v25 }
  0xea   : > { %v260_v27 = vmul.f32 %v428_v16, %v259_v26 }
  0xec   : > { %v261_v28 = vmul.f32 %v260_v27, %v241_v10 }
  0xee   : > { %v263_v29 = vsel %vm262_vm5, %v241_v10, %v261_v28 }
  0xef   : > { %v266_v30 = vsel %vm264_vm6, %v265_v14, %v263_v29 }
  0xf0   : > { %v291_v31 = vsel %vm286_vm2, %v266_v30, 0.0 }
  0xf1   : > { %294 = vst [vmem:[#allocation6 + $0x8] sm:$0xff] %v291_v31 }
  0xf2 PF: > { %p383_p9 = scmp.eq.s32.totalorder %s564_s10, 2  ;;  %s532_s18 = smov [#allocation6]  }
  0xf3   : > { %s301_s19 = sshll.u32 %s532_s18, 4  ;;  %s303_s22 = sshll.u32 %s651_s1, 4  ;;  %s302_s19 = int_to_ptr.vmem [resolvable:$true] %s301_s19  ;;  %s304_s22 = int_to_ptr.hbm [resolvable:$true] %s303_s22 }
  0xf4   : > { %s533_s23 = smov 128   ;;  %s534_s24 = smov 8  }
  0xf5   : > { %375 = dma.vmem_to_hbm [thread:$0]  (%p383_p9), %s302_s19, 384, %s304_s22, [#allocation5], %s533_s23, %s533_s23, %s534_s24  }
  0xf6   : > { %508 = dma.done.wait (%p383_p9), [#allocation5], 384  }
  0xf7   : > { %510 = vsyncadd (%p383_p9), [#allocation5], 4294966912 }
  0xf8 PF: > { %p12_p10 = scmp.ge.s32.totalorder %s567_s11, 5   ;;  %s654_s6 = smov %s517_s7 }
  0xf9   : > { %s655_s7 = smov %s521_s8  ;;  %s656_s8 = smov %s577_s14 }
  0xfa   : > { %s657_s9 = smov %s567_s11  ;;  %14 = sbr.rel (!%p12_p10) target bundleno = 4 (0x4), region = 73 }
  0xff   :  { %320 = vsyncpa [#allocation4], 1 }
 0x100   :  { %322 = vsyncpa [#allocation4 + $0x1], 1 }
 0x101   :  { %323 = vsyncpa [#allocation5], 1 }
 0x102   :  { %325 = vsyncpa [#allocation5 + $0x1], 1 }

</bundles_post_ra>
